<compile_context>
chip_gen: v7x
topology: tpu7x:2x2x1
jax: 0.10.0
libtpu: 0.0.40
codegen_flags: <defaults>
</compile_context>

<pallas_src>
from functools import partial

import jax
import jax.numpy as jnp
from jax.experimental import pallas as pl
from jax.experimental.pallas import tpu as pltpu

EPS = 1e-5  # nn.BatchNorm2d default eps


def _basic_block_kernel(lhs1_ref, rhs1_ref, rhs2_ref, prm_ref, o_ref, ypad_ref,
                        *, n, h, w, cout):
    """Lane-dense slabs: last dim = W*C (=128 here) -> unmasked 128-lane vregs.

    lhs1_ref : (N*H, 3*W*Cin)       bf16  dy-im2row of the H-padded input
    rhs1_ref : (3*W*Cin, 2*W*Cout)  bf16  [conv1 dy-K-stacked | 1x1 downsample]
    rhs2_ref : (3*W*Cout, W*Cout)   bf16  conv2 dy-K-stacked lowered weight
    prm_ref  : (8, W*Cout)          f32   rows: g1, be1, g2, be2, bd, 0, 0, 0
    o_ref    : (N*H, W*Cout)        f32   output slab
    ypad_ref : (N*(H+2), W*Cout)    bf16  scratch: flat H-padded conv1 act
    """
    rows = n * h
    lanes = w * cout
    hp = h + 2
    inv_cnt = 1.0 / float(n * h * w)

    def lane_group_reduce(v):
        # Sum the W lane groups of each channel and broadcast the result back
        # to every lane: log2(W) circular rolls (XLU slot; MXU/VPU stay free).
        for i in range(w.bit_length() - 1):
            v = v + pltpu.roll(v, shift=cout << i, axis=1)
        return v

    def batchnorm(acc, gamma, beta):
        # Two-pass batch statistics in f32 (mean, then centered variance).
        mean = lane_group_reduce(jnp.sum(acc, axis=0, keepdims=True)) * inv_cnt
        d = acc - mean
        var = lane_group_reduce(jnp.sum(d * d, axis=0, keepdims=True)) * inv_cnt
        return d * (gamma * jax.lax.rsqrt(var + EPS)) + beta

    # ---- conv1 (3 dy taps K-stacked) + fused 1x1 downsample: ONE matmul ----
    # rhs1 columns [0, lanes) -> conv1 pre-BN acc, [lanes, 2*lanes) -> residual.
    both = jnp.dot(lhs1_ref[...], rhs1_ref[...],
                   preferred_element_type=jnp.float32)        # (rows, 2*lanes)
    acc1 = both[:, :lanes]
    xd = both[:, lanes:] + prm_ref[4:5, :]                    # + downsample bias

    # conv1 bias omitted: a per-channel constant cancels in the BN mean shift.
    y1 = jnp.maximum(batchnorm(acc1, prm_ref[0:1, :], prm_ref[1:2, :]), 0.0)
    y1 = y1.astype(ypad_ref.dtype)

    # ---- re-pad y1 along H in a flat 2D scratch (zero only the halo rows) ----
    for i in range(n):
        base = i * hp
        ypad_ref[base:base + 1, :] = jnp.zeros((1, lanes), ypad_ref.dtype)
        ypad_ref[base + h + 1:base + h + 2, :] = jnp.zeros((1, lanes),
                                                           ypad_ref.dtype)
        ypad_ref[base + 1:base + 1 + h, :] = y1[i * h:(i + 1) * h, :]

    # ---- conv2: dy-im2row LHS from contiguous sublane-offset 2D views,
    #      then one K-stacked matmul ----
    def dy_window(dy):
        return jnp.concatenate(
            [ypad_ref[i * hp + dy:i * hp + dy + h, :] for i in range(n)],
            axis=0)

    lhs2 = jnp.concatenate([dy_window(dy) for dy in range(3)], axis=-1)
    acc2 = jnp.dot(lhs2, rhs2_ref[...], preferred_element_type=jnp.float32)
    y2 = batchnorm(acc2, prm_ref[2:3, :], prm_ref[3:4, :])

    # ---- residual add + ReLU ----
    o_ref[...] = jnp.maximum(y2 + xd, 0.0)


def prepare_params(p, W):
    """One-time lowering of PyTorch-layout parameters to kernel operands.

    Hoisted out of the per-forward-call path so the O(W^2) kron expansions are
    not redone every call.
    """
    assert W > 0 and (W & (W - 1)) == 0, \
        "lane-group roll-reduce requires a power-of-2 W"
    # TODO(synk): general W needs a different aggregation (unequal roll tree or
    # a tiny matmul); real ResNet widths also need W-tiling (see header TODO).
    Cout = p["w1"].shape[3]

    def lower3x3(wk):
        # 3x3 HWIO conv -> per-dy block-banded (W*ci, W*co) matrices acting on
        # lane-dense slabs (dx taps, channel contraction and x-direction
        # "same" padding fused in), K-stacked over dy into one (3*W*ci, W*co).
        ci, co = wk.shape[2], wk.shape[3]
        mats = []
        for dy in range(3):
            m = jnp.zeros((W * ci, W * co), jnp.float32)
            for dx in range(3):
                e = jnp.eye(W, W, k=1 - dx, dtype=jnp.float32)
                m = m + jnp.kron(e, wk[dy, dx])
            mats.append(m)
        return jnp.concatenate(mats, axis=0)

    rhs1_conv = lower3x3(p["w1"])                             # (3*W*Cin, W*Cout)
    # 1x1 downsample fused as extra N columns; zero rows outside the dy=1 band
    # so it only contracts the un-padded (dy=1) window of the shared LHS.
    wdl = jnp.kron(jnp.eye(W, dtype=jnp.float32), p["wd"])    # (W*Cin, W*Cout)
    zeros = jnp.zeros_like(wdl)
    rhs1_ds = jnp.concatenate([zeros, wdl, zeros], axis=0)
    rhs1 = jnp.concatenate([rhs1_conv, rhs1_ds], axis=1).astype(jnp.bfloat16)

    rhs2 = lower3x3(p["w2"]).astype(jnp.bfloat16)             # (3*W*Cout, W*Cout)

    def lane_tile(v):  # per-channel -> per-lane (channel tiled over W)
        return jnp.tile(v.reshape(-1), W).astype(jnp.float32)

    zero_row = jnp.zeros((W * Cout,), jnp.float32)
    prm = jnp.stack([lane_tile(p["g1"]), lane_tile(p["be1"]),
                     lane_tile(p["g2"]), lane_tile(p["be2"]),
                     lane_tile(p["bd"]),
                     zero_row, zero_row, zero_row], axis=0)   # (8, W*Cout)
    return dict(rhs1=rhs1, rhs2=rhs2, prm=prm)


def basic_block(x_nchw, prepped):
    """x_nchw: [N, Cin, H, W] float32 (PyTorch layout). Returns [N, Cout, H, W]."""
    N, Cin, H, W = x_nchw.shape
    L = prepped["prm"].shape[1]                # W * Cout
    Cout = L // W

    # TODO(synk): the NCHW<->lane-dense plumbing below is layout-only and could
    # be dropped if the caller supplied/consumed NHWC; kept to match PyTorch.
    x_slab = (jnp.transpose(x_nchw, (0, 2, 3, 1))
              .astype(jnp.float32).reshape(N, H, W * Cin))
    xpad = jnp.pad(x_slab, ((0, 0), (1, 1), (0, 0)))
    # dy-im2row done wrapper-side: the kernel receives one contiguous slab and
    # conv1 (+ fused downsample) becomes a single MXU matmul.
    lhs1 = jnp.concatenate([xpad[:, dy:dy + H, :] for dy in range(3)], axis=-1)
    lhs1 = lhs1.reshape(N * H, 3 * W * Cin).astype(jnp.bfloat16)

    rows = N * H
    k1, n1 = prepped["rhs1"].shape
    k2 = prepped["rhs2"].shape[0]
    flops = 2 * rows * (k1 * n1 + k2 * L)
    bytes_accessed = (lhs1.size * 2 + prepped["rhs1"].size * 2
                      + prepped["rhs2"].size * 2 + prepped["prm"].size * 4
                      + rows * L * 4)

    vmem = pl.BlockSpec(memory_space=pltpu.MemorySpace.VMEM)
    kern = partial(_basic_block_kernel, n=N, h=H, w=W, cout=Cout)
    # TODO(synk): for production shapes add a grid over N/H row-tiles
    # ("parallel" row axes, two-pass BN across tiles) and size tiles for
    # v7x's 64 MiB VMEM / raise vmem_limit_bytes on v5e.
    out2d = pl.pallas_call(
        kern,
        out_shape=jax.ShapeDtypeStruct((rows, L), jnp.float32),
        in_specs=[vmem] * 4,
        out_specs=vmem,
        scratch_shapes=[pltpu.VMEM((N * (H + 2), L), jnp.bfloat16)],
        cost_estimate=pl.CostEstimate(flops=flops, transcendentals=2 * L,
                                      bytes_accessed=bytes_accessed),
    )(lhs1, prepped["rhs1"], prepped["rhs2"], prepped["prm"])

    out = out2d.reshape(N, H, W, Cout)
    return jnp.transpose(out, (0, 3, 1, 2))  # back to NCHW


def init_params(key, cin, cout, k=3):
    """Deterministic init mimicking PyTorch's default uniform(-1/sqrt(fan_in), ...)."""
    ks = jax.random.split(key, 6)

    def u(kk, shape, fan_in):
        bound = 1.0 / float(fan_in) ** 0.5
        return jax.random.uniform(kk, shape, jnp.float32, -bound, bound)

    return dict(
        w1=u(ks[0], (k, k, cin, cout), cin * k * k),
        b1=u(ks[1], (1, cout), cin * k * k),
        w2=u(ks[2], (k, k, cout, cout), cout * k * k),
        b2=u(ks[3], (1, cout), cout * k * k),
        wd=u(ks[4], (cin, cout), cin),
        bd=u(ks[5], (1, cout), cin),
        g1=jnp.ones((1, cout), jnp.float32), be1=jnp.zeros((1, cout), jnp.float32),
        g2=jnp.ones((1, cout), jnp.float32), be2=jnp.zeros((1, cout), jnp.float32),
    )


def reference(x_nchw, p):
    """Pure-JAX f32 reference of the same forward pass (for validation)."""
    x = jnp.transpose(x_nchw, (0, 2, 3, 1)).astype(jnp.float32)

    def conv(z, w, b, pad):
        y = jax.lax.conv_general_dilated(
            z, w, (1, 1), [(pad, pad), (pad, pad)],
            dimension_numbers=("NHWC", "HWIO", "NHWC"))
        return y + b.reshape(1, 1, 1, -1)

    def bn(z, g, be):
        mean = jnp.mean(z, axis=(0, 1, 2), keepdims=True)
        var = jnp.mean((z - mean) ** 2, axis=(0, 1, 2), keepdims=True)
        return (z - mean) * jax.lax.rsqrt(var + EPS) * g.reshape(1, 1, 1, -1) \
            + be.reshape(1, 1, 1, -1)

    y = jnp.maximum(bn(conv(x, p["w1"], p["b1"], 1), p["g1"], p["be1"]), 0.0)
    y = bn(conv(y, p["w2"], p["b2"], 1), p["g2"], p["be2"])
    xd = conv(x, p["wd"].reshape(1, 1, *p["wd"].shape), p["bd"], 0)
    return jnp.transpose(jnp.maximum(y + xd, 0.0), (0, 3, 1, 2))


if __name__ == "__main__":
    key = jax.random.PRNGKey(0)
    k_x, k_p = jax.random.split(key)

    N, Cin, Cout, H, W = 2, 4, 8, 16, 16
    x = jax.random.normal(k_x, (N, Cin, H, W), jnp.float32)
    params = init_params(k_p, Cin, Cout)

    # One-time parameter lowering, hoisted out of the per-forward-call path.
    prepped = prepare_params(params, W)

    fwd = jax.jit(basic_block)
    out = jax.block_until_ready(fwd(x, prepped))
    ref = jax.block_until_ready(reference(x, params))

    assert out.shape == (N, Cout, H, W)
    assert jnp.allclose(out, ref, atol=2e-2, rtol=2e-2), (
        "max abs diff = %f" % float(jnp.max(jnp.abs(out - ref))))

    print("KERNEL_OK")
</pallas_src>

<mosaic_0001>
module attributes {stable_mosaic.version = 11 : i64} {
  func.func @_basic_block_kernel(%arg0: memref<32x192xbf16, #tpu.memory_space<vmem>>, %arg1: memref<192x256xbf16, #tpu.memory_space<vmem>>, %arg2: memref<384x128xbf16, #tpu.memory_space<vmem>>, %arg3: memref<8x128xf32, #tpu.memory_space<vmem>>, %arg4: memref<32x128xf32, #tpu.memory_space<vmem>>, %arg5: memref<36x128xbf16, #tpu.memory_space<vmem>>) attributes {dimension_semantics = [], scalar_prefetch = 0 : i64, scratch_operands = 1 : i64, tpu.core_type = #tpu.core_type<tc>} {
    %c0 = arith.constant 0 : index
    %c0_0 = arith.constant 0 : index
    %0 = vector.load %arg0[%c0, %c0_0] : memref<32x192xbf16, #tpu.memory_space<vmem>>, vector<32x192xbf16>
    %c0_1 = arith.constant 0 : index
    %c0_2 = arith.constant 0 : index
    %1 = vector.load %arg1[%c0_1, %c0_2] : memref<192x256xbf16, #tpu.memory_space<vmem>>, vector<192x256xbf16>
    %cst = arith.constant dense<0.000000e+00> : vector<32x256xf32>
    %2 = tpu.matmul %0, %1, %cst {dimension_numbers = #tpu.dot_dimension_numbers<[1], [0], [0], [1], [0, 0, 1, 1], [], []>} : vector<32x192xbf16>, vector<192x256xbf16>, vector<32x256xf32> -> vector<32x256xf32>
    %3 = vector.extract_strided_slice %2 {offsets = [0, 0], sizes = [32, 128], strides = [1, 1]} : vector<32x256xf32> to vector<32x128xf32>
    %4 = vector.extract_strided_slice %2 {offsets = [0, 128], sizes = [32, 128], strides = [1, 1]} : vector<32x256xf32> to vector<32x128xf32>
    %c4 = arith.constant 4 : index
    %c0_3 = arith.constant 0 : index
    %5 = vector.load %arg3[%c4, %c0_3] : memref<8x128xf32, #tpu.memory_space<vmem>>, vector<1x128xf32>
    %6 = vector.broadcast %5 : vector<1x128xf32> to vector<32x128xf32>
    %7 = arith.addf %4, %6 : vector<32x128xf32>
    %c0_4 = arith.constant 0 : index
    %c0_5 = arith.constant 0 : index
    %8 = vector.load %arg3[%c0_4, %c0_5] : memref<8x128xf32, #tpu.memory_space<vmem>>, vector<1x128xf32>
    %c1 = arith.constant 1 : index
    %c0_6 = arith.constant 0 : index
    %9 = vector.load %arg3[%c1, %c0_6] : memref<8x128xf32, #tpu.memory_space<vmem>>, vector<1x128xf32>
    %cst_7 = arith.constant dense<0.000000e+00> : vector<128xf32>
    %10 = vector.multi_reduction <add>, %3, %cst_7 [0] : vector<32x128xf32> to vector<128xf32>
    %11 = vector.shape_cast %10 : vector<128xf32> to vector<1x128xf32>
    %c8_i32 = arith.constant 8 : i32
    %12 = tpu.dynamic_rotate %11 by %c8_i32 dim 1 : vector<1x128xf32>, i32 -> vector<1x128xf32>
    %13 = arith.addf %11, %12 : vector<1x128xf32>
    %c16_i32 = arith.constant 16 : i32
    %14 = tpu.dynamic_rotate %13 by %c16_i32 dim 1 : vector<1x128xf32>, i32 -> vector<1x128xf32>
    %15 = arith.addf %13, %14 : vector<1x128xf32>
    %c32_i32 = arith.constant 32 : i32
    %16 = tpu.dynamic_rotate %15 by %c32_i32 dim 1 : vector<1x128xf32>, i32 -> vector<1x128xf32>
    %17 = arith.addf %15, %16 : vector<1x128xf32>
    %c64_i32 = arith.constant 64 : i32
    %18 = tpu.dynamic_rotate %17 by %c64_i32 dim 1 : vector<1x128xf32>, i32 -> vector<1x128xf32>
    %19 = arith.addf %17, %18 : vector<1x128xf32>
    %cst_8 = arith.constant 0.001953125 : f32
    %20 = vector.broadcast %cst_8 : f32 to vector<1x128xf32>
    %21 = arith.mulf %19, %20 : vector<1x128xf32>
    %22 = vector.broadcast %21 : vector<1x128xf32> to vector<32x128xf32>
    %23 = arith.subf %3, %22 : vector<32x128xf32>
    %24 = arith.mulf %23, %23 : vector<32x128xf32>
    %cst_9 = arith.constant dense<0.000000e+00> : vector<128xf32>
    %25 = vector.multi_reduction <add>, %24, %cst_9 [0] : vector<32x128xf32> to vector<128xf32>
    %26 = vector.shape_cast %25 : vector<128xf32> to vector<1x128xf32>
    %c8_i32_10 = arith.constant 8 : i32
    %27 = tpu.dynamic_rotate %26 by %c8_i32_10 dim 1 : vector<1x128xf32>, i32 -> vector<1x128xf32>
    %28 = arith.addf %26, %27 : vector<1x128xf32>
    %c16_i32_11 = arith.constant 16 : i32
    %29 = tpu.dynamic_rotate %28 by %c16_i32_11 dim 1 : vector<1x128xf32>, i32 -> vector<1x128xf32>
    %30 = arith.addf %28, %29 : vector<1x128xf32>
    %c32_i32_12 = arith.constant 32 : i32
    %31 = tpu.dynamic_rotate %30 by %c32_i32_12 dim 1 : vector<1x128xf32>, i32 -> vector<1x128xf32>
    %32 = arith.addf %30, %31 : vector<1x128xf32>
    %c64_i32_13 = arith.constant 64 : i32
    %33 = tpu.dynamic_rotate %32 by %c64_i32_13 dim 1 : vector<1x128xf32>, i32 -> vector<1x128xf32>
    %34 = arith.addf %32, %33 : vector<1x128xf32>
    %cst_14 = arith.constant 0.001953125 : f32
    %35 = vector.broadcast %cst_14 : f32 to vector<1x128xf32>
    %36 = arith.mulf %34, %35 : vector<1x128xf32>
    %cst_15 = arith.constant 9.99999974E-6 : f32
    %37 = vector.broadcast %cst_15 : f32 to vector<1x128xf32>
    %38 = arith.addf %36, %37 : vector<1x128xf32>
    %39 = math.rsqrt %38 : vector<1x128xf32>
    %40 = arith.mulf %8, %39 : vector<1x128xf32>
    %41 = vector.broadcast %40 : vector<1x128xf32> to vector<32x128xf32>
    %42 = arith.mulf %23, %41 : vector<32x128xf32>
    %43 = vector.broadcast %9 : vector<1x128xf32> to vector<32x128xf32>
    %44 = arith.addf %42, %43 : vector<32x128xf32>
    %cst_16 = arith.constant 0.000000e+00 : f32
    %45 = vector.broadcast %cst_16 : f32 to vector<32x128xf32>
    %46 = arith.maximumf %44, %45 : vector<32x128xf32>
    %47 = arith.truncf %46 : vector<32x128xf32> to vector<32x128xbf16>
    %cst_17 = arith.constant 0.000000e+00 : bf16
    %48 = vector.broadcast %cst_17 : bf16 to vector<1x128xbf16>
    %c0_18 = arith.constant 0 : index
    %c0_19 = arith.constant 0 : index
    %49 = vector.load %arg5[%c0_18, %c0_19] : memref<36x128xbf16, #tpu.memory_space<vmem>>, vector<1x128xbf16>
    tpu.vector_store %arg5[%c0_18, %c0_19], %48 {strides = array<i32>} : memref<36x128xbf16, #tpu.memory_space<vmem>>, vector<1x128xbf16>,
    %cst_20 = arith.constant 0.000000e+00 : bf16
    %50 = vector.broadcast %cst_20 : bf16 to vector<1x128xbf16>
    %c17 = arith.constant 17 : index
    %c0_21 = arith.constant 0 : index
    %51 = vector.load %arg5[%c17, %c0_21] : memref<36x128xbf16, #tpu.memory_space<vmem>>, vector<1x128xbf16>
    tpu.vector_store %arg5[%c17, %c0_21], %50 {strides = array<i32>} : memref<36x128xbf16, #tpu.memory_space<vmem>>, vector<1x128xbf16>,
    %52 = vector.extract_strided_slice %47 {offsets = [0, 0], sizes = [16, 128], strides = [1, 1]} : vector<32x128xbf16> to vector<16x128xbf16>
    %c1_22 = arith.constant 1 : index
    %c0_23 = arith.constant 0 : index
    %53 = vector.load %arg5[%c1_22, %c0_23] : memref<36x128xbf16, #tpu.memory_space<vmem>>, vector<16x128xbf16>
    tpu.vector_store %arg5[%c1_22, %c0_23], %52 {strides = array<i32>} : memref<36x128xbf16, #tpu.memory_space<vmem>>, vector<16x128xbf16>,
    %cst_24 = arith.constant 0.000000e+00 : bf16
    %54 = vector.broadcast %cst_24 : bf16 to vector<1x128xbf16>
    %c18 = arith.constant 18 : index
    %c0_25 = arith.constant 0 : index
    %55 = vector.load %arg5[%c18, %c0_25] : memref<36x128xbf16, #tpu.memory_space<vmem>>, vector<1x128xbf16>
    tpu.vector_store %arg5[%c18, %c0_25], %54 {strides = array<i32>} : memref<36x128xbf16, #tpu.memory_space<vmem>>, vector<1x128xbf16>,
    %cst_26 = arith.constant 0.000000e+00 : bf16
    %56 = vector.broadcast %cst_26 : bf16 to vector<1x128xbf16>
    %c35 = arith.constant 35 : index
    %c0_27 = arith.constant 0 : index
    %57 = vector.load %arg5[%c35, %c0_27] : memref<36x128xbf16, #tpu.memory_space<vmem>>, vector<1x128xbf16>
    tpu.vector_store %arg5[%c35, %c0_27], %56 {strides = array<i32>} : memref<36x128xbf16, #tpu.memory_space<vmem>>, vector<1x128xbf16>,
    %58 = vector.extract_strided_slice %47 {offsets = [16, 0], sizes = [16, 128], strides = [1, 1]} : vector<32x128xbf16> to vector<16x128xbf16>
    %c19 = arith.constant 19 : index
    %c0_28 = arith.constant 0 : index
    %59 = vector.load %arg5[%c19, %c0_28] : memref<36x128xbf16, #tpu.memory_space<vmem>>, vector<16x128xbf16>
    tpu.vector_store %arg5[%c19, %c0_28], %58 {strides = array<i32>} : memref<36x128xbf16, #tpu.memory_space<vmem>>, vector<16x128xbf16>,
    %c0_29 = arith.constant 0 : index
    %c0_30 = arith.constant 0 : index
    %60 = vector.load %arg5[%c0_29, %c0_30] : memref<36x128xbf16, #tpu.memory_space<vmem>>, vector<16x128xbf16>
    %c18_31 = arith.constant 18 : index
    %c0_32 = arith.constant 0 : index
    %61 = vector.load %arg5[%c18_31, %c0_32] : memref<36x128xbf16, #tpu.memory_space<vmem>>, vector<16x128xbf16>
    %62 = tpu.concatenate %60, %61 in 0 : vector<16x128xbf16>, vector<16x128xbf16> -> vector<32x128xbf16>
    %c1_33 = arith.constant 1 : index
    %c0_34 = arith.constant 0 : index
    %63 = vector.load %arg5[%c1_33, %c0_34] : memref<36x128xbf16, #tpu.memory_space<vmem>>, vector<16x128xbf16>
    %c19_35 = arith.constant 19 : index
    %c0_36 = arith.constant 0 : index
    %64 = vector.load %arg5[%c19_35, %c0_36] : memref<36x128xbf16, #tpu.memory_space<vmem>>, vector<16x128xbf16>
    %65 = tpu.concatenate %63, %64 in 0 : vector<16x128xbf16>, vector<16x128xbf16> -> vector<32x128xbf16>
    %c2 = arith.constant 2 : index
    %c0_37 = arith.constant 0 : index
    %66 = vector.load %arg5[%c2, %c0_37] : memref<36x128xbf16, #tpu.memory_space<vmem>>, vector<16x128xbf16>
    %c20 = arith.constant 20 : index
    %c0_38 = arith.constant 0 : index
    %67 = vector.load %arg5[%c20, %c0_38] : memref<36x128xbf16, #tpu.memory_space<vmem>>, vector<16x128xbf16>
    %68 = tpu.concatenate %66, %67 in 0 : vector<16x128xbf16>, vector<16x128xbf16> -> vector<32x128xbf16>
    %69 = tpu.concatenate %62, %65, %68 in 1 : vector<32x128xbf16>, vector<32x128xbf16>, vector<32x128xbf16> -> vector<32x384xbf16>
    %c0_39 = arith.constant 0 : index
    %c0_40 = arith.constant 0 : index
    %70 = vector.load %arg2[%c0_39, %c0_40] : memref<384x128xbf16, #tpu.memory_space<vmem>>, vector<384x128xbf16>
    %cst_41 = arith.constant dense<0.000000e+00> : vector<32x128xf32>
    %71 = tpu.matmul %69, %70, %cst_41 {dimension_numbers = #tpu.dot_dimension_numbers<[1], [0], [0], [1], [0, 0, 1, 1], [], []>} : vector<32x384xbf16>, vector<384x128xbf16>, vector<32x128xf32> -> vector<32x128xf32>
    %c2_42 = arith.constant 2 : index
    %c0_43 = arith.constant 0 : index
    %72 = vector.load %arg3[%c2_42, %c0_43] : memref<8x128xf32, #tpu.memory_space<vmem>>, vector<1x128xf32>
    %c3 = arith.constant 3 : index
    %c0_44 = arith.constant 0 : index
    %73 = vector.load %arg3[%c3, %c0_44] : memref<8x128xf32, #tpu.memory_space<vmem>>, vector<1x128xf32>
    %cst_45 = arith.constant dense<0.000000e+00> : vector<128xf32>
    %74 = vector.multi_reduction <add>, %71, %cst_45 [0] : vector<32x128xf32> to vector<128xf32>
    %75 = vector.shape_cast %74 : vector<128xf32> to vector<1x128xf32>
    %c8_i32_46 = arith.constant 8 : i32
    %76 = tpu.dynamic_rotate %75 by %c8_i32_46 dim 1 : vector<1x128xf32>, i32 -> vector<1x128xf32>
    %77 = arith.addf %75, %76 : vector<1x128xf32>
    %c16_i32_47 = arith.constant 16 : i32
    %78 = tpu.dynamic_rotate %77 by %c16_i32_47 dim 1 : vector<1x128xf32>, i32 -> vector<1x128xf32>
    %79 = arith.addf %77, %78 : vector<1x128xf32>
    %c32_i32_48 = arith.constant 32 : i32
    %80 = tpu.dynamic_rotate %79 by %c32_i32_48 dim 1 : vector<1x128xf32>, i32 -> vector<1x128xf32>
    %81 = arith.addf %79, %80 : vector<1x128xf32>
    %c64_i32_49 = arith.constant 64 : i32
    %82 = tpu.dynamic_rotate %81 by %c64_i32_49 dim 1 : vector<1x128xf32>, i32 -> vector<1x128xf32>
    %83 = arith.addf %81, %82 : vector<1x128xf32>
    %cst_50 = arith.constant 0.001953125 : f32
    %84 = vector.broadcast %cst_50 : f32 to vector<1x128xf32>
    %85 = arith.mulf %83, %84 : vector<1x128xf32>
    %86 = vector.broadcast %85 : vector<1x128xf32> to vector<32x128xf32>
    %87 = arith.subf %71, %86 : vector<32x128xf32>
    %88 = arith.mulf %87, %87 : vector<32x128xf32>
    %cst_51 = arith.constant dense<0.000000e+00> : vector<128xf32>
    %89 = vector.multi_reduction <add>, %88, %cst_51 [0] : vector<32x128xf32> to vector<128xf32>
    %90 = vector.shape_cast %89 : vector<128xf32> to vector<1x128xf32>
    %c8_i32_52 = arith.constant 8 : i32
    %91 = tpu.dynamic_rotate %90 by %c8_i32_52 dim 1 : vector<1x128xf32>, i32 -> vector<1x128xf32>
    %92 = arith.addf %90, %91 : vector<1x128xf32>
    %c16_i32_53 = arith.constant 16 : i32
    %93 = tpu.dynamic_rotate %92 by %c16_i32_53 dim 1 : vector<1x128xf32>, i32 -> vector<1x128xf32>
    %94 = arith.addf %92, %93 : vector<1x128xf32>
    %c32_i32_54 = arith.constant 32 : i32
    %95 = tpu.dynamic_rotate %94 by %c32_i32_54 dim 1 : vector<1x128xf32>, i32 -> vector<1x128xf32>
    %96 = arith.addf %94, %95 : vector<1x128xf32>
    %c64_i32_55 = arith.constant 64 : i32
    %97 = tpu.dynamic_rotate %96 by %c64_i32_55 dim 1 : vector<1x128xf32>, i32 -> vector<1x128xf32>
    %98 = arith.addf %96, %97 : vector<1x128xf32>
    %cst_56 = arith.constant 0.001953125 : f32
    %99 = vector.broadcast %cst_56 : f32 to vector<1x128xf32>
    %100 = arith.mulf %98, %99 : vector<1x128xf32>
    %cst_57 = arith.constant 9.99999974E-6 : f32
    %101 = vector.broadcast %cst_57 : f32 to vector<1x128xf32>
    %102 = arith.addf %100, %101 : vector<1x128xf32>
    %103 = math.rsqrt %102 : vector<1x128xf32>
    %104 = arith.mulf %72, %103 : vector<1x128xf32>
    %105 = vector.broadcast %104 : vector<1x128xf32> to vector<32x128xf32>
    %106 = arith.mulf %87, %105 : vector<32x128xf32>
    %107 = vector.broadcast %73 : vector<1x128xf32> to vector<32x128xf32>
    %108 = arith.addf %106, %107 : vector<32x128xf32>
    %109 = arith.addf %108, %7 : vector<32x128xf32>
    %cst_58 = arith.constant 0.000000e+00 : f32
    %110 = vector.broadcast %cst_58 : f32 to vector<32x128xf32>
    %111 = arith.maximumf %109, %110 : vector<32x128xf32>
    %c0_59 = arith.constant 0 : index
    %c0_60 = arith.constant 0 : index
    %112 = vector.load %arg4[%c0_59, %c0_60] : memref<32x128xf32, #tpu.memory_space<vmem>>, vector<32x128xf32>
    tpu.vector_store %arg4[%c0_59, %c0_60], %111 {strides = array<i32>} : memref<32x128xf32, #tpu.memory_space<vmem>>, vector<32x128xf32>,
    return
  }
}

</mosaic_0001>

<bundles_post_ra>
// kernel: basic_block.1
= control target key start
LH: loop header
LB: loop body
LE: loop exit
PB: predicated region body
PF: predicated region fallthrough
CT: control target
= control target key end

     0   :  { %vm184_vm0 = vcmask 523264   ;;  %s1112_s19 = smov 32   ;;  %s1113_s20 = smov 64   ;;  %v277_v51 = vlaneseq  ;;  %vm336_vm1 = vcmask 1040384   ;;  %vm337_vm2 = vsmask.f32 256  ;;  %s1426_s1 = inlined_call_operand.vmem [shape: bf16[192,256], index: 1, kind: input, shape index: {}]   ;;  %s1427_s0 = inlined_call_operand.vmem [shape: bf16[32,192], index: 0, kind: input, shape index: {}]   ;;  %s1428_s2 = inlined_call_operand.vmem [shape: bf16[384,128], index: 2, kind: input, shape index: {}]   ;;  %s1429_s3 = inlined_call_operand.vmem [shape: f32[8,128], index: 3, kind: input, shape index: {}]   ;;  %s1430_s4 = inlined_call_operand.vmem [shape: f32[32,128], index: 4, kind: output, shape index: {}]  }
   0x1   :  { %v1033_v0 = vld [vmem:[%s1426_s1 + $0x4] ss:$8 sps:$4 sm:$0xff]   ;;  %v1035_v1 = vld [vmem:[%s1426_s1] ss:$8 sps:$4 sm:$0xff]   ;;  %v1036_v2 = vld [vmem:[%s1426_s1 + $0x14] ss:$8 sps:$4 sm:$0xff]  }
   0x2   :  { %191 = vmatprep.subr.bf16.mxu0 %v1033_v0  ;;  %v1038_v3 = vld [vmem:[%s1426_s1 + $0x10] ss:$8 sps:$4 sm:$0xff]   ;;  %v1039_v4 = vld [vmem:[%s1426_s1 + $0x24] ss:$8 sps:$4 sm:$0xff]   ;;  %v1041_v5 = vld [vmem:[%s1426_s1 + $0x20] ss:$8 sps:$4 sm:$0xff]  }
   0x3   :  { %192 = vmatpush1.bf16.msra.mxu0 %v1035_v1  ;;  %v1042_v6 = vld [vmem:[%s1426_s1 + $0x34] ss:$8 sps:$4 sm:$0xff]   ;;  %v1044_v7 = vld [vmem:[%s1426_s1 + $0x30] ss:$8 sps:$4 sm:$0xff]   ;;  %v1045_v8 = vld [vmem:[%s1426_s1 + $0x44] ss:$8 sps:$4 sm:$0xff]  }
   0x4   :  { %193 = vmatprep.subr.bf16.mxu0 %v1036_v2  ;;  %v1047_v9 = vld [vmem:[%s1426_s1 + $0x40] ss:$8 sps:$4 sm:$0xff]   ;;  %v1048_v10 = vld [vmem:[%s1426_s1 + $0x54] ss:$8 sps:$4 sm:$0xff]   ;;  %v1071_v11 = vld [vmem:[%s1427_s0 + $0x4] ss:$8 sps:$4 sm:$0xff]  }
   0x5   :  { %v1050_v12 = vld [vmem:[%s1426_s1 + $0x50] ss:$8 sps:$4 sm:$0xff]   ;;  %927 = vmatprep.mubr.msk.bf16.mxu0 %vm184_vm0, %v1071_v11  ;;  %v1051_v13 = vld [vmem:[%s1426_s1 + $0x64] ss:$8 sps:$4 sm:$0xff]   ;;  %v1053_v14 = vld [vmem:[%s1426_s1 + $0x60] ss:$8 sps:$4 sm:$0xff]  }
   0x6   :  { %v1054_v15 = vld [vmem:[%s1426_s1 + $0x74] ss:$8 sps:$4 sm:$0xff]   ;;  %v1056_v16 = vld [vmem:[%s1426_s1 + $0x70] ss:$8 sps:$4 sm:$0xff]   ;;  %v1057_v17 = vld [vmem:[%s1426_s1 + $0x84] ss:$8 sps:$4 sm:$0xff]  }
   0x7   :  { %194 = vmatpush1.bf16.msra.mxu0 %v1038_v3  ;;  %v1059_v18 = vld [vmem:[%s1426_s1 + $0x80] ss:$8 sps:$4 sm:$0xff]   ;;  %v1060_v19 = vld [vmem:[%s1426_s1 + $0x94] ss:$8 sps:$4 sm:$0xff]   ;;  %v1062_v20 = vld [vmem:[%s1426_s1 + $0x90] ss:$8 sps:$4 sm:$0xff]  }
   0x8   :  { %195 = vmatprep.subr.bf16.mxu0 %v1039_v4  ;;  %v1063_v21 = vld [vmem:[%s1426_s1 + $0xa4] ss:$8 sps:$4 sm:$0xff]   ;;  %v1065_v22 = vld [vmem:[%s1426_s1 + $0xa0] ss:$8 sps:$4 sm:$0xff]   ;;  %v1066_v23 = vld [vmem:[%s1426_s1 + $0xb4] ss:$8 sps:$4 sm:$0xff]  }
   0x9   :  { %v1068_v24 = vld [vmem:[%s1426_s1 + $0xb0] ss:$8 sps:$4 sm:$0xff]   ;;  %v1069_v25 = vld [vmem:[%s1427_s0] ss:$8 sps:$4 sm:$0xff]   ;;  %v1072_v26 = vld [vmem:[%s1427_s0 + $0x14] ss:$8 sps:$4 sm:$0xff]  }
   0xa   :  { %v1074_v27 = vld [vmem:[%s1427_s0 + $0x10] ss:$8 sps:$4 sm:$0xff]   ;;  %s1110_s0 = smov 8   ;;  %s1111_s1 = smov 16   ;;  %v278_v52 = vshrl.u32 %v277_v51, 7  ;;  %vm1259_vm3 = vmand %vm336_vm1, %vm337_vm2  ;;  %vm383_vm6 = vcmask 1041409  }
   0xb   :  { %196 = vmatpush1.bf16.msra.mxu0 %v1041_v5  ;;  %vm342_vm4 = vsmask.f32 7938  ;;  %vm384_vm7 = vsmask.f32 1280  ;;  %vm389_vm8 = vsmask.f32 7942 }
   0xc   :  { %197 = vmatprep.subr.bf16.mxu0 %v1042_v6  ;;  %v1237_v54 = vsub.s32 0, %v278_v52  ;;  %vm343_vm5 = vmand %vm336_vm1, %vm342_vm4  ;;  %v253_v51 = vld [vmem:[%s1429_s3] sm:$0x1]  ;;  %vm352_vm11 = vsmask.f32 4368  ;;  %vm374_vm12 = vcmask 1043456  }
   0xd   :  { %vm385_vm9 = vmand %vm383_vm6, %vm384_vm7  ;;  %vm423_vm13 = vcmask 1043457   ;;  %vm399_vm14 = vsmask.f32 5392  ;;  %vm429_vm15 = vcmask 1041408  }
   0xe   :  { %vm390_vm10 = vmand %vm383_vm6, %vm389_vm8  ;;  %vm480_vm6 = vsmask.f32 6400 }
   0xf   :  { %198 = vmatpush1.bf16.msra.mxu0 %v1044_v7  ;;  %vm1342_vm1 = vmand %vm374_vm12, %vm342_vm4 }
  0x10   :  { %199 = vmatprep.subr.bf16.mxu0 %v1045_v8  ;;  %vm400_vm4 = vmor %vm384_vm7, %vm399_vm14 }
  0x13   :  { %200 = vmatpush1.bf16.msra.mxu0 %v1047_v9 }
  0x14   :  { %201 = vmatprep.subr.bf16.mxu0 %v1048_v10 }
  0x17   :  { %202 = vmatpush1.bf16.msra.mxu0 %v1050_v12 }
  0x18   :  { %203 = vmatprep.subr.bf16.mxu0 %v1051_v13 }
  0x1b   :  { %204 = vmatpush1.bf16.msra.mxu0 %v1053_v14  ;;  %v339_v14 = vld [vmem:[#allocation2] sm:$0x1] }
  0x1c   :  { %205 = vmatprep.subr.bf16.mxu0 %v1054_v15  ;;  %v344_v15 = vld [vmem:[#allocation2 + $0x8] sm:$0x1] }
  0x1f   :  { %206 = vmatpush1.bf16.msra.mxu0 %v1056_v16  ;;  %v340_v16 = vsel %vm1259_vm3, 0, %v339_v14 }
  0x20   :  { %207 = vmatprep.subr.bf16.mxu0 %v1057_v17  ;;  %341 = vst [vmem:[#allocation2] sm:$0x1] %v340_v16  ;;  %v345_v17 = vsel %vm343_vm5, 0, %v344_v15  ;;  %vm430_vm5 = vmand %vm429_vm15, %vm384_vm7  ;;  %vm453_vm7 = vcmask 1046528  }
  0x21   :  { %346 = vst [vmem:[#allocation2 + $0x8] sm:$0x1] %v345_v17 }
  0x23   :  { %208 = vmatpush1.bf16.msra.mxu0 %v1059_v18  ;;  %v386_v18 = vld [vmem:[#allocation2 + $0x8] sm:$0x2] }
  0x24   :  { %209 = vmatprep.subr.bf16.mxu0 %v1060_v19  ;;  %v391_v19 = vld [vmem:[#allocation2 + $0x10] sm:$0x2] }
  0x27   :  { %210 = vmatpush1.bf16.msra.mxu0 %v1062_v20  ;;  %v387_v20 = vsel %vm385_vm9, 0, %v386_v18  ;;  %v376_v17 = vld [vmem:[#allocation2] sm:$0xf] }
  0x28   :  { %211 = vmatprep.subr.bf16.mxu0 %v1063_v21  ;;  %388 = vst [vmem:[#allocation2 + $0x8] sm:$0x2] %v387_v20  ;;  %v392_v21 = vsel %vm390_vm10, 0, %v391_v19 }
  0x29   :  { %393 = vst [vmem:[#allocation2 + $0x10] sm:$0x2] %v392_v21 }
  0x2b   :  { %212 = vmatpush1.bf16.msra.mxu0 %v1065_v22 }
  0x2c   :  { %213 = vmatprep.subr.bf16.mxu0 %v1066_v23 }
  0x2f   :  { %214 = vmatpush1.bf16.msra.mxu0 %v1068_v24 }
  0x32   :  { %224 = vmatmul.mubr.bf16.vlgmr.msra.gmra.mrb[0].mxu0 %v1069_v25 }
  0x33   :  { %928 = vmatprep.mubr.msk.bf16.mxu0 %vm184_vm0, %v1072_v26  ;;  %v1075_v26 = vld [vmem:[%s1428_s2 + $0x40] sm:$0xff]   ;;  %vm1336_vm0 = vmor %vm337_vm2, %vm352_vm11 }
  0x34   :  { %971 = vmatprep.subr.bf16.mxu1 %v1075_v26  ;;  %vm1348_vm2 = vmand %vm423_vm13, %vm389_vm8  ;;  %vm511_vm8 = vcmask 1045504  }
  0x3a   :  { %234 = vmatmul.mubr.bf16.gmra.mrb[4].mxu0 %v1074_v27  ;;  %v1076_v27 = vld [vmem:[%s1428_s2] sm:$0xff]  }
  0x3b   :  { %972 = vmatpush3.bf16.msra.mxu1 %v1076_v27 }
 0x105   :  { %v225_v28 = vpop.f32.mrb[0].mxu0 }
 0x106   :  { %v1225_v29 = vpop.f32.mrb[1].mxu0 }
 0x107   :  { %v229_v30 = vpop.f32.mrb[2].mxu0 }
 0x108   :  { %v255_v31 = vadd.f32 %v229_v30, %v225_v28  ;;  %v1227_v32 = vpop.f32.mrb[3].mxu0 }
 0x10d   :  { %v235_v33 = vpop.f32.mrb[4].mxu0 }
 0x10e   :  { %v256_v34 = vadd.f32 %v255_v31, %v235_v33  ;;  %v1229_v35 = vpop.f32.mrb[5].mxu0  ;;  %v1079_v31 = vld [vmem:[%s1428_s2 + $0x50] sm:$0xff]  }
 0x10f   :  { %v239_v36 = vpop.f32.mrb[6].mxu0 }
 0x110   :  { %v257_v37 = vadd.f32 %v256_v34, %v239_v36  ;;  %v1231_v38 = vpop.f32.mrb[7].mxu0  ;;  %v1081_v34 = vld [vmem:[%s1428_s2 + $0x58] sm:$0xff]  }
 0x112   :  { %v258_v39 = vrot.slane %v257_v37, 4 }
 0x114   :  { %v259_v40 = vadd.f32 %v258_v39, %v257_v37  ;;  %v1083_v37 = vld [vmem:[%s1428_s2 + $0x60] sm:$0xff]  }
 0x115   :  { %v1084_v39 = vld [vmem:[%s1428_s2 + $0x20] sm:$0xff]  }
 0x116   :  { %v260_v41 = vrot.slane %v259_v40, 2 }
 0x118   :  { %v261_v42 = vadd.f32 %v260_v41, %v259_v40  ;;  %v1085_v40 = vld [vmem:[%s1428_s2 + $0x68] sm:$0xff]  }
 0x119   :  { %v1086_v41 = vld [vmem:[%s1428_s2 + $0x28] sm:$0xff]  }
 0x11a   :  { %v262_v43 = vrot.slane %v261_v42, 1 }
 0x11c   :  { %v263_v44 = vadd.f32 %v262_v43, %v261_v42  ;;  %v1087_v42 = vld [vmem:[%s1428_s2 + $0x70] sm:$0xff]  }
 0x11d   :  { %v1088_v43 = vld [vmem:[%s1428_s2 + $0x30] sm:$0xff]  }
 0x11e   :  { %264 = vrot.lane.b32.xlu0 %v263_v44, %s1110_s0 }
 0x190   :  { %v265_v45 = vpop.permute.xlu0 %264 }
 0x191   :  { %v266_v46 = vadd.f32 %v265_v45, %v263_v44  ;;  %v1089_v44 = vld [vmem:[%s1428_s2 + $0x78] sm:$0xff]  }
 0x192   :  { %v1090_v45 = vld [vmem:[%s1428_s2 + $0x38] sm:$0xff]  }
 0x193   :  { %267 = vrot.lane.b32.xlu0 %v266_v46, %s1111_s1 }
 0x205   :  { %v268_v47 = vpop.permute.xlu0 %267 }
 0x206   :  { %v269_v48 = vadd.f32 %v268_v47, %v266_v46  ;;  %v1321_v46 = vld [vmem:[%s1428_s2 + $0x80] sm:$0xff]  }
 0x208   :  { %270 = vrot.lane.b32.xlu1 %v269_v48, %s1112_s19 }
 0x27a   :  { %v271_v49 = vpop.permute.xlu1 %270 }
 0x27b   :  { %v272_v50 = vadd.f32 %v271_v49, %v269_v48 }
 0x27d   :  { %273 = vrot.lane.b32.xlu1 %v272_v50, %s1113_s20 }
 0x2ef   :  { %v274_v53 = vpop.permute.xlu1 %273 }
 0x2f0   :  { %v275_v55 = vadd.f32 %v274_v53, %v272_v50 }
 0x2f2   :  { %v276_v56 = vmul.f32 0.001953125, %v275_v55 }
 0x2f4   :  { %v280_v57 = vrot.slane %v276_v56, %v1237_v54  ;;  %v930_v56 = vld [vmem:[%s1429_s3 + $0x1] ss:$0 sm:$0xff] }
 0x2f6   :  { %v1240_v58 = vsub.f32 %v225_v28, %v280_v57  ;;  %v1242_v59 = vsub.f32 %v229_v30, %v280_v57  ;;  %v1244_v60 = vsub.f32 %v235_v33, %v280_v57  ;;  %v1246_v61 = vsub.f32 %v239_v36, %v280_v57  ;;  %v1077_v28 = vld [vmem:[%s1428_s2 + $0x48] sm:$0xff]   ;;  %v1080_v33 = vld [vmem:[%s1428_s2 + $0x10] sm:$0xff]   ;;  %v1082_v36 = vld [vmem:[%s1428_s2 + $0x18] sm:$0xff]  }
 0x2f7   :  { %v1078_v30 = vld [vmem:[%s1428_s2 + $0x8] sm:$0xff]   ;;  %973 = vmatprep.subr.bf16.mxu1 %v1077_v28 }
 0x2f8   :  { %v285_v62 = vmul.f32 %v1240_v58, %v1240_v58  ;;  %v286_v63 = vmul.f32 %v1242_v59, %v1242_v59  ;;  %v287_v0 = vmul.f32 %v1244_v60, %v1244_v60  ;;  %v288_v2 = vmul.f32 %v1246_v61, %v1246_v61  ;;  %974 = vmatpush3.bf16.msra.mxu1 %v1078_v30  ;;  %v425_v30 = vld [vmem:[#allocation2 + $0x8] sm:$0xe] }
 0x2f9   :  { %975 = vmatprep.subr.bf16.mxu1 %v1079_v31 }
 0x2fa   :  { %v289_v1 = vadd.f32 %v286_v63, %v285_v62 }
 0x2fc   :  { %v290_v3 = vadd.f32 %v289_v1, %v287_v0  ;;  %976 = vmatpush3.bf16.msra.mxu1 %v1080_v33 }
 0x2fd   :  { %977 = vmatprep.subr.bf16.mxu1 %v1081_v34 }
 0x2fe   :  { %v291_v4 = vadd.f32 %v290_v3, %v288_v2 }
 0x300   :  { %v292_v5 = vrot.slane %v291_v4, 4  ;;  %978 = vmatpush3.bf16.msra.mxu1 %v1082_v36 }
 0x301   :  { %979 = vmatprep.subr.bf16.mxu1 %v1083_v37 }
 0x302   :  { %v293_v6 = vadd.f32 %v292_v5, %v291_v4 }
 0x304   :  { %v294_v7 = vrot.slane %v293_v6, 2  ;;  %980 = vmatpush3.bf16.msra.mxu1 %v1084_v39 }
 0x305   :  { %981 = vmatprep.subr.bf16.mxu1 %v1085_v40  ;;  %v431_v40 = vld [vmem:[#allocation2 + $0x10] sm:$0x3] }
 0x306   :  { %v295_v8 = vadd.f32 %v294_v7, %v293_v6 }
 0x308   :  { %v296_v9 = vrot.slane %v295_v8, 1  ;;  %982 = vmatpush3.bf16.msra.mxu1 %v1086_v41 }
 0x309   :  { %983 = vmatprep.subr.bf16.mxu1 %v1087_v42 }
 0x30a   :  { %v297_v10 = vadd.f32 %v296_v9, %v295_v8 }
 0x30c   :  { %298 = vrot.lane.b32.xlu0 %v297_v10, %s1110_s0  ;;  %984 = vmatpush3.bf16.msra.mxu1 %v1088_v43 }
 0x30d   :  { %985 = vmatprep.subr.bf16.mxu1 %v1089_v44 }
 0x310   :  { %986 = vmatpush3.bf16.msra.mxu1 %v1090_v45 }
 0x311   :  { %1009 = vmatprep.subr.bf16.mxu1 %v1321_v46 }
 0x37e   :  { %v299_v11 = vpop.permute.xlu0 %298 }
 0x37f   :  { %v300_v12 = vadd.f32 %v299_v11, %v297_v10 }
 0x381   :  { %301 = vrot.lane.b32.xlu1 %v300_v12, %s1111_s1 }
 0x3f3   :  { %v302_v22 = vpop.permute.xlu1 %301 }
 0x3f4   :  { %v303_v23 = vadd.f32 %v302_v22, %v300_v12  ;;  %v1100_v22 = vld [vmem:[%s1428_s2 + $0x98] sm:$0xff]  }
 0x3f6   :  { %304 = vrot.lane.b32.xlu0 %v303_v23, %s1112_s19 }
 0x468   :  { %v305_v24 = vpop.permute.xlu0 %304 }
 0x469   :  { %v306_v25 = vadd.f32 %v305_v24, %v303_v23  ;;  %v380_v23 = vld [vmem:[#allocation2 + $0x8] sm:$0x1] }
 0x46b   :  { %307 = vrot.lane.b32.xlu1 %v306_v25, %s1113_s20 }
 0x4dd   :  { %v308_v47 = vpop.permute.xlu1 %307 }
 0x4de   :  { %v309_v48 = vadd.f32 %v308_v47, %v306_v25 }
 0x4e0   :  { %v310_v49 = vmul.f32 0.001953125, %v309_v48 }
 0x4e2   :  { %v311_v50 = vadd.f32 1e-05, %v310_v49 }
 0x4e4   :  { %1106 = vrsqrt.f32 %v311_v50 }
 0x4ee   :  { %v1107_v52 = vpop.eup %1106 }
 0x4ef   :  { %v313_v53 = vmul.f32 %v1107_v52, %v253_v51 }
 0x4f1   :  { %v317_v55 = vrot.slane %v313_v53, %v1237_v54 }
 0x4f3   :  { %v318_v57 = vmul.f32 %v317_v55, %v1240_v58  ;;  %v319_v62 = vmul.f32 %v317_v55, %v1242_v59  ;;  %v320_v63 = vmul.f32 %v317_v55, %v1244_v60  ;;  %v321_v0 = vmul.f32 %v317_v55, %v1246_v61 }
 0x4f5   :  { %v326_v1 = vadd.f32 %v930_v56, %v318_v57  ;;  %v327_v2 = vadd.f32 %v930_v56, %v319_v62  ;;  %v328_v3 = vadd.f32 %v930_v56, %v320_v63  ;;  %v329_v4 = vadd.f32 %v930_v56, %v321_v0 }
 0x4f7   :  { %v330_v5 = vmax.f32 %v326_v1, 0.0  ;;  %v331_v6 = vmax.f32 %v327_v2, 0.0  ;;  %v332_v7 = vmax.f32 %v328_v3, 0.0  ;;  %v333_v8 = vmax.f32 %v329_v4, 0.0 }
 0x4f9   :  { %v967_v9 = vpack.c.bf16 %v330_v5, %v330_v5  ;;  %v968_v10 = vpack.c.bf16 %v331_v6, %v331_v6  ;;  %v969_v11 = vpack.c.bf16 %v332_v7, %v332_v7  ;;  %v970_v12 = vpack.c.bf16 %v333_v8, %v333_v8 }
 0x4fb   :  { %v355_v58 = vshrl.u32 %v967_v9, 16  ;;  %v363_v59 = vshrl.u32 %v968_v10, 16  ;;  %v402_v60 = vshrl.u32 %v969_v11, 16  ;;  %v405_v61 = vshll.u32 %v969_v11, 16 }
 0x4fc   :  { %v411_v14 = vshrl.u32 %v970_v12, 16  ;;  %v414_v15 = vshll.u32 %v970_v12, 16  ;;  %v358_v19 = vshll.u32 %v967_v9, 16  ;;  %v366_v21 = vshll.u32 %v968_v10, 16 }
 0x4fd   :  { %v357_v18 = vrot.slane %v355_v58, 7  ;;  %v365_v20 = vrot.slane %v363_v59, 7  ;;  %v404_v24 = vrot.slane %v402_v60, 6  ;;  %v407_v25 = vrot.slane %v405_v61, 7  ;;  %v1096_v59 = vld [vmem:[%s1428_s2 + $0x88] sm:$0xff]  }
 0x4fe   :  { %v413_v26 = vrot.slane %v411_v14, 6  ;;  %v416_v27 = vrot.slane %v414_v15, 7 }
 0x4ff   :  { %v360_v31 = vor.u32 %v358_v19, %v357_v18  ;;  %v361_v33 = vrot.slane %v357_v18, 4  ;;  %v368_v34 = vor.u32 %v366_v21, %v365_v20  ;;  %v370_v36 = vrot.slane %v365_v20, 4 }
 0x500   :  { %v408_v37 = vor.u32 %v407_v25, %v404_v24  ;;  %v417_v39 = vor.u32 %v416_v27, %v413_v26  ;;  %v1101_v24 = vld [vmem:[%s1428_s2 + $0xa0] sm:$0xff]   ;;  %v1102_v25 = vld [vmem:[%s1428_s2 + $0xa8] sm:$0xff]   ;;  %v1103_v26 = vld [vmem:[%s1428_s2 + $0xb0] sm:$0xff]  }
 0x501   :  { %v369_v41 = vsel %vm1336_vm0, %v361_v33, %v368_v34  ;;  %v377_v42 = vsel %vm1342_vm1, %v360_v31, %v376_v17  ;;  %v381_v43 = vsel %vm1259_vm3, %v370_v36, %v380_v23  ;;  %vm463_vm3 = vsmask.f32 7424  ;;  %v1097_v17 = vld [vmem:[%s1428_s2 + $0x90] sm:$0xff]   ;;  %v1104_v27 = vld [vmem:[%s1428_s2 + $0xb8] sm:$0xff]  }
 0x502   :  { %378 = vst [vmem:[#allocation2] sm:$0xf] %v377_v42  ;;  %379 = vst [vmem:[#allocation2 + $0x4] sm:$0xf] %v369_v41  ;;  %v409_v44 = vrot.slane %v408_v37, 4  ;;  %v419_v45 = vrot.slane %v417_v39, 4  ;;  %v426_v47 = vsel %vm1348_vm2, %v408_v37, %v425_v30 }
 0x503   :  { %382 = vst [vmem:[#allocation2 + $0x8] sm:$0x1] %v381_v43  ;;  %427 = vst [vmem:[#allocation2 + $0x8] sm:$0xe] %v426_v47 }
 0x504   :  { %v418_v48 = vsel %vm400_vm4, %v409_v44, %v417_v39  ;;  %v432_v49 = vsel %vm430_vm5, %v419_v45, %v431_v40 }
 0x505   :  { %428 = vst [vmem:[#allocation2 + $0xc] sm:$0xf] %v418_v48  ;;  %433 = vst [vmem:[#allocation2 + $0x10] sm:$0x3] %v432_v49 }
 0x509   :  { %v434_v50 = vld [vmem:[#allocation2] sm:$0xf]  ;;  %v435_v51 = vld [vmem:[#allocation2 + $0x4] sm:$0xf] }
 0x50a   :  { %v935_v52 = vcombine.low %v434_v50, %v435_v51  ;;  %v1092_v53 = vld [vmem:[#allocation2 + $0x8] ss:$0 sps:$4 sm:$0x11]   ;;  %v436_v56 = vld [vmem:[#allocation2 + $0x8] sm:$0xe] }
 0x50b   :  { %v472_v13 = vshll.u32 %v1092_v53, 16  ;;  %v499_v12 = vld [vmem:[#allocation2] sm:$0xe]  ;;  %v505_v21 = vrot.slane %v1092_v53, 1  ;;  %v500_v28 = vld [vmem:[#allocation2 + $0x8] sm:$0xc] }
 0x50c   :  { %v467_v55 = vshll.u32 %v935_v52, 16  ;;  %v437_v57 = vld [vmem:[#allocation2 + $0xc] sm:$0xf]  ;;  %v1364_v63 = vld [vmem:[#allocation2 + $0x10] ss:$0 sps:$4 sm:$0x33]   ;;  %v940_v15 = vcombine.low %v499_v12, %v435_v51 }
 0x50d   :  { %v936_v62 = vcombine.low %v436_v56, %v437_v57  ;;  %v465_v0 = vshrl.u32 %v935_v52, 16  ;;  %v490_v4 = vshrl.u32 %v1364_v63, 16  ;;  %v493_v5 = vshll.u32 %v1364_v63, 16  ;;  %v1098_v14 = vld [vmem:[#allocation2 + $0x10] ss:$0 sps:$4 sm:$0x11]  }
 0x50e   :  { %v469_v1 = vrot.slane %v467_v55, 1  ;;  %v474_v7 = vrot.slane %v472_v13, 1  ;;  %v455_v19 = vrot.slane %v1098_v14, 1  ;;  %v504_v20 = vrot.slane %v940_v15, 1 }
 0x50f   :  { %v482_v2 = vshrl.u32 %v936_v62, 16  ;;  %v485_v3 = vshll.u32 %v936_v62, 16  ;;  %v492_v10 = vrot.slane %v490_v4, 1  ;;  %v495_v11 = vrot.slane %v493_v5, 2 }
 0x510   :  { %v470_v6 = vor.u32 %v469_v1, %v465_v0  ;;  %v454_v18 = vrot.slane %v936_v62, 1  ;;  %v941_v30 = vcombine.low %v500_v28, %v437_v57  ;;  %v513_v33 = vrot.slane %v1364_v63, 2 }
 0x511   :  { %v484_v8 = vrot.slane %v482_v2, 1  ;;  %v487_v9 = vrot.slane %v485_v3, 2  ;;  %v496_v61 = vor.u32 %v495_v11, %v492_v10 }
 0x512   :  { %v475_v58 = vsel %vm463_vm3, %v470_v6, %v474_v7  ;;  %v456_v23 = vsel %vm453_vm7, %v454_v18, %v455_v19  ;;  %v512_v31 = vrot.slane %v941_v30, 2 }
 0x513   :  { %740 = vmatprep.mubr.bf16.mxu1 %v475_v58  ;;  %v488_v60 = vor.u32 %v487_v9, %v484_v8 }
 0x514   :  { %741 = vmatmul.mubr.bf16.vlgmr.msra.gmra.mrb[0].mxu1 %v935_v52  ;;  %v514_v34 = vsel %vm511_vm8, %v512_v31, %v513_v33 }
 0x515   :  { %1010 = vmatpush3.bf16.msra.mxu1 %v1321_v46  ;;  %v497_v16 = vsel %vm480_vm6, %v488_v60, %v496_v61  ;;  %v506_v46 = vsel %vm453_vm7, %v504_v20, %v505_v21 }
 0x516   :  { %748 = vmatprep.mubr.bf16.mxu1 %v497_v16  ;;  %1011 = vmatprep.subr.bf16.mxu1 %v1096_v59 }
 0x519   :  { %1012 = vmatpush3.bf16.msra.mxu1 %v1096_v59 }
 0x51a   :  { %1013 = vmatprep.subr.bf16.mxu1 %v1097_v17 }
 0x51c   :  { %749 = vmatmul.mubr.bf16.gmra.mrb[4].mxu1 %v456_v23 }
 0x51d   :  { %1014 = vmatpush3.bf16.msra.mxu1 %v1097_v17  ;;  %1025 = vmatprep.mubr.bf16.mxu1 %v506_v46 }
 0x51e   :  { %1015 = vmatprep.subr.bf16.mxu1 %v1100_v22 }
 0x521   :  { %1016 = vmatpush3.bf16.msra.mxu1 %v1100_v22 }
 0x522   :  { %1017 = vmatprep.subr.bf16.mxu1 %v1101_v24 }
 0x525   :  { %1018 = vmatpush3.bf16.msra.mxu1 %v1101_v24 }
 0x526   :  { %1019 = vmatprep.subr.bf16.mxu1 %v1102_v25 }
 0x529   :  { %1020 = vmatpush3.bf16.msra.mxu1 %v1102_v25 }
 0x52a   :  { %1021 = vmatprep.subr.bf16.mxu1 %v1103_v26 }
 0x52d   :  { %1022 = vmatpush3.bf16.msra.mxu1 %v1103_v26 }
 0x52e   :  { %1023 = vmatprep.subr.bf16.mxu1 %v1104_v27 }
 0x531   :  { %1024 = vmatpush3.bf16.msra.mxu1 %v1104_v27 }
 0x534   :  { %1026 = vmatmul.mubr.bf16.vlgmr.msra.gmra.mrb[8].mxu1 %v514_v34 }
 0x5e7   :  { %v987_v36 = vpop.f32.mrb[0].mxu1 }
 0x5e8   :  { %v988_v37 = vpop.f32.mrb[1].mxu1 }
 0x5e9   :  { %v989_v39 = vadd.f32 %v988_v37, %v987_v36  ;;  %v990_v40 = vpop.f32.mrb[2].mxu1 }
 0x5ea   :  { %v991_v41 = vpop.f32.mrb[3].mxu1 }
 0x5eb   :  { %v992_v42 = vadd.f32 %v991_v41, %v990_v40 }
 0x5ef   :  { %v993_v43 = vpop.f32.mrb[4].mxu1 }
 0x5f0   :  { %v994_v44 = vpop.f32.mrb[5].mxu1 }
 0x5f1   :  { %v995_v45 = vadd.f32 %v994_v44, %v993_v43  ;;  %v996_v47 = vpop.f32.mrb[6].mxu1  ;;  %v806_v44 = vld [vmem:[%s1429_s3 + $0x2] sm:$0x1] }
 0x5f2   :  { %v997_v48 = vpop.f32.mrb[7].mxu1 }
 0x5f3   :  { %v998_v49 = vadd.f32 %v997_v48, %v996_v47  ;;  %v929_v48 = vld [vmem:[%s1429_s3 + $0x4] ss:$0 sm:$0xff] }
 0x607   :  { %v1027_v50 = vpop.f32.mrb[8].mxu1 }
 0x608   :  { %v800_v51 = vadd.f32 %v1027_v50, %v995_v45  ;;  %v791_v52 = vpop.f32.mrb[9].mxu1  ;;  %v966_v50 = vld [vmem:[%s1429_s3 + $0x3] ss:$0 sm:$0xff] }
 0x609   :  { %v792_v53 = vadd.f32 %v989_v39, %v791_v52  ;;  %v1028_v55 = vpop.f32.mrb[10].mxu1 }
 0x60a   :  { %v803_v13 = vadd.f32 %v1028_v55, %v998_v49  ;;  %v794_v56 = vpop.f32.mrb[11].mxu1 }
 0x60b   :  { %v795_v57 = vadd.f32 %v992_v42, %v794_v56  ;;  %v250_v56 = vadd.f32 %v929_v48, %v1227_v32 }
 0x60d   :  { %v808_v62 = vadd.f32 %v795_v57, %v792_v53 }
 0x60f   :  { %v809_v63 = vadd.f32 %v808_v62, %v800_v51  ;;  %v252_v62 = vadd.f32 %v929_v48, %v1231_v38 }
 0x611   :  { %v810_v0 = vadd.f32 %v809_v63, %v803_v13 }
 0x613   :  { %v811_v1 = vrot.slane %v810_v0, 4 }
 0x615   :  { %v812_v2 = vadd.f32 %v811_v1, %v810_v0 }
 0x617   :  { %v813_v3 = vrot.slane %v812_v2, 2 }
 0x619   :  { %v814_v4 = vadd.f32 %v813_v3, %v812_v2 }
 0x61b   :  { %v815_v5 = vrot.slane %v814_v4, 1 }
 0x61d   :  { %v816_v6 = vadd.f32 %v815_v5, %v814_v4 }
 0x61f   :  { %817 = vrot.lane.b32.xlu0 %v816_v6, %s1110_s0 }
 0x691   :  { %v818_v7 = vpop.permute.xlu0 %817 }
 0x692   :  { %v819_v8 = vadd.f32 %v818_v7, %v816_v6 }
 0x694   :  { %820 = vrot.lane.b32.xlu1 %v819_v8, %s1111_s1 }
 0x706   :  { %v821_v9 = vpop.permute.xlu1 %820 }
 0x707   :  { %v822_v10 = vadd.f32 %v821_v9, %v819_v8 }
 0x709   :  { %823 = vrot.lane.b32.xlu0 %v822_v10, %s1112_s19 }
 0x77b   :  { %v824_v11 = vpop.permute.xlu0 %823 }
 0x77c   :  { %v825_v12 = vadd.f32 %v824_v11, %v822_v10 }
 0x77e   :  { %826 = vrot.lane.b32.xlu1 %v825_v12, %s1113_s20 }
 0x7f0   :  { %v827_v58 = vpop.permute.xlu1 %826 }
 0x7f1   :  { %v828_v59 = vadd.f32 %v827_v58, %v825_v12 }
 0x7f3   :  { %v829_v60 = vmul.f32 0.001953125, %v828_v59 }
 0x7f5   :  { %v833_v61 = vrot.slane %v829_v60, %v1237_v54 }
 0x7f7   :  { %v834_v14 = vsub.f32 %v792_v53, %v833_v61  ;;  %v835_v15 = vsub.f32 %v795_v57, %v833_v61  ;;  %v836_v16 = vsub.f32 %v800_v51, %v833_v61  ;;  %v837_v17 = vsub.f32 %v803_v13, %v833_v61 }
 0x7f8   :  { %v249_v13 = vadd.f32 %v929_v48, %v1225_v29  ;;  %v251_v57 = vadd.f32 %v929_v48, %v1229_v35 }
 0x7f9   :  { %v838_v18 = vmul.f32 %v834_v14, %v834_v14  ;;  %v839_v19 = vmul.f32 %v835_v15, %v835_v15  ;;  %v840_v20 = vmul.f32 %v836_v16, %v836_v16  ;;  %v841_v22 = vmul.f32 %v837_v17, %v837_v17 }
 0x7fb   :  { %v842_v21 = vadd.f32 %v839_v19, %v838_v18 }
 0x7fd   :  { %v843_v23 = vadd.f32 %v842_v21, %v840_v20 }
 0x7ff   :  { %v844_v46 = vadd.f32 %v843_v23, %v841_v22 }
 0x801   :  { %v845_v24 = vrot.slane %v844_v46, 4 }
 0x803   :  { %v846_v25 = vadd.f32 %v845_v24, %v844_v46 }
 0x805   :  { %v847_v26 = vrot.slane %v846_v25, 2 }
 0x807   :  { %v848_v27 = vadd.f32 %v847_v26, %v846_v25 }
 0x809   :  { %v849_v28 = vrot.slane %v848_v27, 1 }
 0x80b   :  { %v850_v30 = vadd.f32 %v849_v28, %v848_v27 }
 0x80d   :  { %851 = vrot.lane.b32.xlu0 %v850_v30, %s1110_s0 }
 0x87f   :  { %v852_v31 = vpop.permute.xlu0 %851 }
 0x880   :  { %v853_v33 = vadd.f32 %v852_v31, %v850_v30 }
 0x882   :  { %854 = vrot.lane.b32.xlu1 %v853_v33, %s1111_s1 }
 0x8f4   :  { %v855_v34 = vpop.permute.xlu1 %854 }
 0x8f5   :  { %v856_v36 = vadd.f32 %v855_v34, %v853_v33 }
 0x8f7   :  { %857 = vrot.lane.b32.xlu0 %v856_v36, %s1112_s19 }
 0x969   :  { %v858_v37 = vpop.permute.xlu0 %857 }
 0x96a   :  { %v859_v39 = vadd.f32 %v858_v37, %v856_v36 }
 0x96c   :  { %860 = vrot.lane.b32.xlu1 %v859_v39, %s1113_s20 }
 0x9de   :  { %v861_v40 = vpop.permute.xlu1 %860 }
 0x9df   :  { %v862_v41 = vadd.f32 %v861_v40, %v859_v39 }
 0x9e1   :  { %v863_v42 = vmul.f32 0.001953125, %v862_v41 }
 0x9e3   :  { %v864_v43 = vadd.f32 1e-05, %v863_v42 }
 0x9e5   :  { %1108 = vrsqrt.f32 %v864_v43 }
 0x9ef   :  { %v1109_v45 = vpop.eup %1108 }
 0x9f0   :  { %v866_v47 = vmul.f32 %v1109_v45, %v806_v44 }
 0x9f2   :  { %v870_v49 = vrot.slane %v866_v47, %v1237_v54 }
 0x9f4   :  { %v871_v51 = vmul.f32 %v870_v49, %v834_v14  ;;  %v872_v52 = vmul.f32 %v870_v49, %v835_v15  ;;  %v873_v53 = vmul.f32 %v870_v49, %v836_v16  ;;  %v874_v55 = vmul.f32 %v870_v49, %v837_v17 }
 0x9f6   :  { %v879_v63 = vadd.f32 %v966_v50, %v871_v51  ;;  %v880_v0 = vadd.f32 %v966_v50, %v872_v52  ;;  %v881_v1 = vadd.f32 %v966_v50, %v873_v53  ;;  %v882_v54 = vadd.f32 %v966_v50, %v874_v55 }
 0x9f8   :  { %v883_v2 = vadd.f32 %v879_v63, %v249_v13  ;;  %v884_v3 = vadd.f32 %v880_v0, %v250_v56  ;;  %v885_v4 = vadd.f32 %v881_v1, %v251_v57  ;;  %v886_v5 = vadd.f32 %v882_v54, %v252_v62 }
 0x9fa   :  { %v887_v6 = vmax.f32 %v883_v2, 0.0  ;;  %v888_v7 = vmax.f32 %v884_v3, 0.0  ;;  %v889_v8 = vmax.f32 %v885_v4, 0.0  ;;  %v890_v9 = vmax.f32 %v886_v5, 0.0 }
 0x9fc   :  { %891 = vst [vmem:[%s1430_s4] sm:$0xff] %v887_v6  ;;  %892 = vst [vmem:[%s1430_s4 + $0x8] sm:$0xff] %v888_v7 }
 0x9fd   :  { %893 = vst [vmem:[%s1430_s4 + $0x10] sm:$0xff] %v889_v8  ;;  %894 = vst [vmem:[%s1430_s4 + $0x18] sm:$0xff] %v890_v9 }

</bundles_post_ra>
